<compile_context>
chip_gen: v7x
topology: tpu7x:2x2x1
jax: 0.10.0
libtpu: 0.0.40
codegen_flags: <defaults>
</compile_context>

<pallas_src>
import functools

import jax
import jax.numpy as jnp
from jax.experimental import pallas as pl
from jax.experimental.pallas import tpu as pltpu

ALPHA = 0.5
BETA = 0.5            # referenced (but unused) by the PyTorch forward signature
CE_RATIO = 0.5
EPS = 1e-7            # TODO(synk): the reference clamps with an undefined `e`; 1e-7 assumed.
SMOOTH = 1.0

_LANES = 128
_SUBLANES = 8
_MAIN_CHUNKS = 8                       # sub-chunks per main block (bounds temporaries)
_TAIL_TILE_CAP = 2048                  # max rows per tail block (<= 1 MiB f32)
_VMEM_LIMIT_BYTES = 32 * 1024 * 1024   # raises v5e's 16 MiB scoped default; <= v6e/v7x


def _cdiv(a, b):
    return -(-a // b)


def _round_up(a, b):
    return _cdiv(a, b) * b


def _default_tile_rows():
    """Main block height: bigger on v7x (fast HBM amortizes per-step overhead)."""
    try:
        info = pltpu.get_tpu_info()
        vmem = int(getattr(info, "vmem_capacity_bytes", 0) or 0)
        if 0 < vmem <= 64 * 1024 * 1024:   # v7x-class core (64 MiB VMEM / TC)
            return 8192
    except Exception:
        pass
    return 4096                             # v5e / v6e


def _partial_sums_kernel(x_ref, t_ref, acc_ref, *, chunk_rows, n_chunks,
                         hard_targets):
    """Accumulates five (8,128) vector partial-sum planes per grid split.

    acc_ref: f32[1, 5, 8, 128]
      plane 0: sum(x*t)         plane 1: sum(x)            plane 2: sum(t)
      plane 3: sum(t*log(xc))   plane 4: sum((1-t)*log(1-xc))
    Cross-lane reduction and the ~10-flop dice / weighted-CE combine happen
    once in the JAX wrapper.
    """
    step = pl.program_id(1)

    @pl.when(step == 0)
    def _init():
        acc_ref[...] = jnp.zeros_like(acc_ref)

    def fold(v):
        # (chunk_rows, 128) -> (8, 128): leading-dim-only reshape (layout free)
        # followed by pure VALU vreg adds; no XLU work in the hot loop.
        return jnp.sum(v.reshape(-1, _SUBLANES, _LANES), axis=0)

    def chunk_body(c, carry):
        s_xt, s_x, s_t, s_a, s_b = carry
        r0 = pl.multiple_of(c * chunk_rows, chunk_rows)
        x = x_ref[pl.ds(r0, chunk_rows), :].astype(jnp.float32)
        t = t_ref[pl.ds(r0, chunk_rows), :].astype(jnp.float32)
        xc = jnp.clip(x, EPS, 1.0 - EPS)
        if hard_targets:
            # Single transcendental per element (valid for {0,1} targets only).
            log_arg = jnp.log(jnp.where(t > 0.5, xc, 1.0 - xc))
            a = t * log_arg
            b = (1.0 - t) * log_arg
        else:
            a = t * jnp.log(xc)
            b = (1.0 - t) * jnp.log(1.0 - xc)
        return (s_xt + fold(x * t), s_x + fold(x), s_t + fold(t),
                s_a + fold(a), s_b + fold(b))

    zeros = jnp.zeros((_SUBLANES, _LANES), jnp.float32)
    init = (zeros, zeros, zeros, zeros, zeros)
    s_xt, s_x, s_t, s_a, s_b = jax.lax.fori_loop(
        0, n_chunks, chunk_body, init, unroll=True)

    acc_ref[0, 0] += s_xt
    acc_ref[0, 1] += s_x
    acc_ref[0, 2] += s_t
    acc_ref[0, 3] += s_a
    acc_ref[0, 4] += s_b


def _input_block_spec(block_shape, index_map, buffers):
    if buffers is not None and buffers != 2:
        try:
            return pl.BlockSpec(block_shape, index_map,
                                pipeline_mode=pl.Buffered(buffers))
        except TypeError:          # BlockSpec without pipeline_mode support
            pass
    return pl.BlockSpec(block_shape, index_map)


def _run_partial_sums(x2d, t2d, *, num_splits, steps_per_split, tile_rows,
                      chunk_rows, hard_targets, input_buffers):
    rows, lanes = x2d.shape
    assert lanes == _LANES
    assert rows == num_splits * steps_per_split * tile_rows
    assert tile_rows % chunk_rows == 0
    n_chunks = tile_rows // chunk_rows

    kernel = functools.partial(
        _partial_sums_kernel,
        chunk_rows=chunk_rows,
        n_chunks=n_chunks,
        hard_targets=hard_targets,
    )
    in_map = lambda s, i: (s * steps_per_split + i, 0)

    n_elems = rows * _LANES
    cost = pl.CostEstimate(
        flops=12 * n_elems,
        transcendentals=(1 if hard_targets else 2) * n_elems,
        bytes_accessed=n_elems * (x2d.dtype.itemsize + t2d.dtype.itemsize),
    )

    return pl.pallas_call(
        kernel,
        out_shape=jax.ShapeDtypeStruct((num_splits, 5, _SUBLANES, _LANES),
                                       jnp.float32),
        grid_spec=pltpu.PrefetchScalarGridSpec(
            num_scalar_prefetch=0,
            grid=(num_splits, steps_per_split),
            in_specs=[
                _input_block_spec((tile_rows, _LANES), in_map, input_buffers),
                _input_block_spec((tile_rows, _LANES), in_map, input_buffers),
            ],
            out_specs=pl.BlockSpec((1, 5, _SUBLANES, _LANES),
                                   lambda s, i: (s, 0, 0, 0)),
        ),
        compiler_params=pltpu.CompilerParams(
            # Leading split axis is "parallel" so v7x can shard the stream
            # across its 2 TensorCores; reduction axis stays "arbitrary".
            dimension_semantics=("parallel", "arbitrary"),
            vmem_limit_bytes=_VMEM_LIMIT_BYTES,
        ),
        cost_estimate=cost,
    )(x2d, t2d)


def combo_loss(inputs, targets, *, smooth=SMOOTH, tile_rows=None, num_splits=2,
               hard_targets=False):
    """Pallas ComboLoss.  inputs/targets: matching shapes (e.g. NCHW probs)."""
    n_elements = int(inputs.size)
    assert n_elements == int(targets.size) and n_elements > 0

    if tile_rows is None:
        tile_rows = _default_tile_rows()
    # Main block rows: a multiple of _MAIN_CHUNKS * 8 sublanes, >= 512.
    tile_rows = max(512, (int(tile_rows) // 512) * 512)
    main_chunk_rows = tile_rows // _MAIN_CHUNKS

    x = inputs.reshape(-1)
    t = targets.reshape(-1)

    block_elems = tile_rows * _LANES
    steps_total = n_elements // block_elems
    num_splits = max(1, min(int(num_splits), steps_total)) if steps_total else 1
    steps_per_split = steps_total // num_splits if steps_total else 0
    main_elems = num_splits * steps_per_split * block_elems

    partials = []

    if main_elems:
        # Aligned prefix: native dtype streamed straight into the kernel, no
        # padding, no masking, no extra HBM pass.
        x_main = x[:main_elems].reshape(-1, _LANES)
        t_main = t[:main_elems].reshape(-1, _LANES)
        partials.append(_run_partial_sums(
            x_main, t_main,
            num_splits=num_splits, steps_per_split=steps_per_split,
            tile_rows=tile_rows, chunk_rows=main_chunk_rows,
            hard_targets=hard_targets,
            input_buffers=3 if tile_rows <= 4096 else 2))

    tail_elems = n_elements - main_elems
    pad_count = 0
    if tail_elems:
        # Only the small tail slab is padded (and therefore copied).
        tail_rows = _cdiv(tail_elems, _LANES)
        tail_tile_rows = min(_round_up(tail_rows, _SUBLANES), _TAIL_TILE_CAP)
        steps_tail = _cdiv(tail_rows, tail_tile_rows)
        tail_rows_padded = steps_tail * tail_tile_rows
        pad_count = tail_rows_padded * _LANES - tail_elems

        x_tail = jnp.pad(x[main_elems:], (0, pad_count)).reshape(-1, _LANES)
        t_tail = jnp.pad(t[main_elems:], (0, pad_count)).reshape(-1, _LANES)
        partials.append(_run_partial_sums(
            x_tail, t_tail,
            num_splits=1, steps_per_split=steps_tail,
            tile_rows=tail_tile_rows, chunk_rows=tail_tile_rows,
            hard_targets=hard_targets, input_buffers=2))

    totals = jnp.zeros((5,), jnp.float32)
    for p in partials:
        totals = totals + jnp.sum(p, axis=(0, 2, 3))
    intersection, sum_x, sum_t, sum_a, sum_b = (
        totals[0], totals[1], totals[2], totals[3], totals[4])

    # Zero-padded tail elements (x=0, t=0) contribute nothing to planes 0-3 and
    # exactly log(1 - clip(0, EPS, 1-EPS)) each to plane 4; subtract that closed
    # form here instead of masking inside the streaming loop.
    if pad_count:
        xc0 = jnp.clip(jnp.float32(0.0), EPS, 1.0 - EPS)
        sum_b = sum_b - jnp.float32(pad_count) * jnp.log(1.0 - xc0)

    dice = (2.0 * intersection + smooth) / (sum_x + sum_t + smooth)
    weighted_ce = -(ALPHA * (sum_a + (1.0 - ALPHA) * sum_b)) / jnp.float32(n_elements)
    return CE_RATIO * weighted_ce - (1.0 - CE_RATIO) * dice


def _combo_loss_ref(inputs, targets):
    """Pure-JAX reference mirroring the PyTorch forward, for sanity checking."""
    x = inputs.reshape(-1).astype(jnp.float32)
    t = targets.reshape(-1).astype(jnp.float32)
    intersection = jnp.sum(x * t)
    dice = (2.0 * intersection + SMOOTH) / (jnp.sum(x) + jnp.sum(t) + SMOOTH)
    xc = jnp.clip(x, EPS, 1.0 - EPS)
    out = -(ALPHA * (t * jnp.log(xc) + (1.0 - ALPHA) * (1.0 - t) * jnp.log(1.0 - xc)))
    weighted_ce = jnp.mean(out)
    return CE_RATIO * weighted_ce - (1.0 - CE_RATIO) * dice


if __name__ == "__main__":
    key = jax.random.PRNGKey(0)
    k1, k2, k3, k4, k5, k6 = jax.random.split(key, 6)

    # 1) Small segmentation-style NCHW shape: probabilities + binary targets.
    shape = (2, 4, 16, 16)
    inputs = jax.random.uniform(k1, shape, dtype=jnp.float32)
    targets = (jax.random.uniform(k2, shape, dtype=jnp.float32) > 0.5).astype(jnp.float32)
    loss = jax.block_until_ready(jax.jit(lambda a, b: combo_loss(a, b))(inputs, targets))
    ref = jax.block_until_ready(_combo_loss_ref(inputs, targets))
    assert jnp.allclose(loss, ref, rtol=1e-4, atol=1e-5), (loss, ref)

    # 2) Ragged size (not a multiple of 128): exercises tail padding + closed-form
    #    CE-pad correction.
    shape2 = (3, 3, 7, 11)
    inputs2 = jax.random.uniform(k3, shape2, dtype=jnp.float32)
    targets2 = (jax.random.uniform(k4, shape2, dtype=jnp.float32) > 0.5).astype(jnp.float32)
    loss2 = jax.block_until_ready(jax.jit(lambda a, b: combo_loss(a, b))(inputs2, targets2))
    ref2 = jax.block_until_ready(_combo_loss_ref(inputs2, targets2))
    assert jnp.allclose(loss2, ref2, rtol=1e-4, atol=1e-5), (loss2, ref2)

    # 3) Hard-target fast path (single log per element) on binary targets.
    loss3 = jax.block_until_ready(
        jax.jit(lambda a, b: combo_loss(a, b, hard_targets=True))(inputs, targets))
    assert jnp.allclose(loss3, ref, rtol=1e-4, atol=1e-5), (loss3, ref)

    # 4) Shape large enough (with a small forced tile) to exercise the split main
    #    pallas_call path + remainder-block tail path together.
    shape3 = (1, 3, 256, 257)
    inputs3 = jax.random.uniform(k5, shape3, dtype=jnp.float32)
    targets3 = (jax.random.uniform(k6, shape3, dtype=jnp.float32) > 0.5).astype(jnp.float32)
    loss4 = jax.block_until_ready(
        jax.jit(lambda a, b: combo_loss(a, b, tile_rows=512, num_splits=2))(inputs3, targets3))
    ref4 = jax.block_until_ready(_combo_loss_ref(inputs3, targets3))
    assert jnp.allclose(loss4, ref4, rtol=1e-4, atol=2e-5), (loss4, ref4)

    print("KERNEL_OK")
</pallas_src>

<mosaic_0001>
module attributes {stable_mosaic.version = 11 : i64} {
  func.func @_partial_sums_kernel(%arg0: i32, %arg1: i32, %arg2: memref<16x128xf32, #tpu.memory_space<vmem>>, %arg3: memref<16x128xf32, #tpu.memory_space<vmem>>, %arg4: memref<1x5x8x128xf32, #tpu.memory_space<vmem>>) attributes {dimension_semantics = [#tpu.dimension_semantics<parallel>, #tpu.dimension_semantics<arbitrary>], iteration_bounds = array<i64: 1, 1>, scalar_prefetch = 0 : i64, scratch_operands = 0 : i64, tpu.core_type = #tpu.core_type<tc>, window_params = [{transform_indices = @transform_0, window_bounds = array<i64: 16, 128>}, {transform_indices = @transform_1, window_bounds = array<i64: 16, 128>}, {transform_indices = @transform_2, window_bounds = array<i64: 1, 5, 8, 128>}]} {
    %c0_i32 = arith.constant 0 : i32
    %0 = arith.cmpi eq, %arg1, %c0_i32 : i32
    %1 = arith.extui %0 : i1 to i32
    %c0_i32_0 = arith.constant 0 : i32
    %2 = arith.cmpi ne, %1, %c0_i32_0 : i32
    scf.if %2 {
      %cst_48 = arith.constant 0.000000e+00 : f32
      %68 = vector.broadcast %cst_48 : f32 to vector<1x5x8x128xf32>
      %c0_49 = arith.constant 0 : index
      %c0_50 = arith.constant 0 : index
      %c0_51 = arith.constant 0 : index
      %c0_52 = arith.constant 0 : index
      %69 = vector.load %arg4[%c0_49, %c0_50, %c0_51, %c0_52] : memref<1x5x8x128xf32, #tpu.memory_space<vmem>>, vector<1x5x8x128xf32>
      tpu.vector_store %arg4[%c0_49, %c0_50, %c0_51, %c0_52], %68 {strides = array<i32>} : memref<1x5x8x128xf32, #tpu.memory_space<vmem>>, vector<1x5x8x128xf32>,
    } else {
    }
    %cst = arith.constant 0.000000e+00 : f32
    %3 = vector.broadcast %cst : f32 to vector<8x128xf32>
    %c0_i32_1 = arith.constant 0 : i32
    %c16_i32 = arith.constant 16 : i32
    %4 = arith.muli %c0_i32_1, %c16_i32 : i32
    %5 = tpu.assume_multiple %4, 16 : i32
    %6 = arith.index_cast %5 : i32 to index
    %c0 = arith.constant 0 : index
    %7 = vector.load %arg2[%6, %c0] : memref<16x128xf32, #tpu.memory_space<vmem>>, vector<16x128xf32>
    %8 = arith.index_cast %5 : i32 to index
    %c0_2 = arith.constant 0 : index
    %9 = vector.load %arg3[%8, %c0_2] : memref<16x128xf32, #tpu.memory_space<vmem>>, vector<16x128xf32>
    %cst_3 = arith.constant 1.000000e-07 : f32
    %cst_4 = arith.constant 0.99999988 : f32
    %10 = vector.broadcast %cst_3 : f32 to vector<16x128xf32>
    %11 = arith.maximumf %10, %7 : vector<16x128xf32>
    %12 = vector.broadcast %cst_4 : f32 to vector<16x128xf32>
    %13 = arith.minimumf %12, %11 : vector<16x128xf32>
    %14 = math.log %13 : vector<16x128xf32>
    %15 = arith.mulf %9, %14 : vector<16x128xf32>
    %cst_5 = arith.constant 1.000000e+00 : f32
    %16 = vector.broadcast %cst_5 : f32 to vector<16x128xf32>
    %17 = arith.subf %16, %9 : vector<16x128xf32>
    %cst_6 = arith.constant 1.000000e+00 : f32
    %18 = vector.broadcast %cst_6 : f32 to vector<16x128xf32>
    %19 = arith.subf %18, %13 : vector<16x128xf32>
    %20 = math.log %19 : vector<16x128xf32>
    %21 = arith.mulf %17, %20 : vector<16x128xf32>
    %22 = arith.mulf %7, %9 : vector<16x128xf32>
    %23 = vector.shape_cast %22 : vector<16x128xf32> to vector<2x8x128xf32>
    %cst_7 = arith.constant dense<0.000000e+00> : vector<8x128xf32>
    %24 = vector.multi_reduction <add>, %23, %cst_7 [0] : vector<2x8x128xf32> to vector<8x128xf32>
    %25 = arith.addf %3, %24 : vector<8x128xf32>
    %26 = vector.shape_cast %7 : vector<16x128xf32> to vector<2x8x128xf32>
    %cst_8 = arith.constant dense<0.000000e+00> : vector<8x128xf32>
    %27 = vector.multi_reduction <add>, %26, %cst_8 [0] : vector<2x8x128xf32> to vector<8x128xf32>
    %28 = arith.addf %3, %27 : vector<8x128xf32>
    %29 = vector.shape_cast %9 : vector<16x128xf32> to vector<2x8x128xf32>
    %cst_9 = arith.constant dense<0.000000e+00> : vector<8x128xf32>
    %30 = vector.multi_reduction <add>, %29, %cst_9 [0] : vector<2x8x128xf32> to vector<8x128xf32>
    %31 = arith.addf %3, %30 : vector<8x128xf32>
    %32 = vector.shape_cast %15 : vector<16x128xf32> to vector<2x8x128xf32>
    %cst_10 = arith.constant dense<0.000000e+00> : vector<8x128xf32>
    %33 = vector.multi_reduction <add>, %32, %cst_10 [0] : vector<2x8x128xf32> to vector<8x128xf32>
    %34 = arith.addf %3, %33 : vector<8x128xf32>
    %35 = vector.shape_cast %21 : vector<16x128xf32> to vector<2x8x128xf32>
    %cst_11 = arith.constant dense<0.000000e+00> : vector<8x128xf32>
    %36 = vector.multi_reduction <add>, %35, %cst_11 [0] : vector<2x8x128xf32> to vector<8x128xf32>
    %37 = arith.addf %3, %36 : vector<8x128xf32>
    %c1_i32 = arith.constant 1 : i32
    %c0_12 = arith.constant 0 : index
    %c0_13 = arith.constant 0 : index
    %c0_14 = arith.constant 0 : index
    %c0_15 = arith.constant 0 : index
    %38 = vector.load %arg4[%c0_12, %c0_13, %c0_14, %c0_15] : memref<1x5x8x128xf32, #tpu.memory_space<vmem>>, vector<1x1x8x128xf32>
    %39 = vector.shape_cast %38 : vector<1x1x8x128xf32> to vector<8x128xf32>
    %40 = arith.addf %39, %25 : vector<8x128xf32>
    %c0_16 = arith.constant 0 : index
    %c0_17 = arith.constant 0 : index
    %c0_18 = arith.constant 0 : index
    %c0_19 = arith.constant 0 : index
    %41 = vector.load %arg4[%c0_16, %c0_17, %c0_18, %c0_19] : memref<1x5x8x128xf32, #tpu.memory_space<vmem>>, vector<1x1x8x128xf32>
    %42 = vector.shape_cast %41 : vector<1x1x8x128xf32> to vector<8x128xf32>
    %43 = vector.shape_cast %40 : vector<8x128xf32> to vector<1x1x8x128xf32>
    tpu.vector_store %arg4[%c0_16, %c0_17, %c0_18, %c0_19], %43 {strides = array<i32>} : memref<1x5x8x128xf32, #tpu.memory_space<vmem>>, vector<1x1x8x128xf32>,
    %c0_20 = arith.constant 0 : index
    %c1 = arith.constant 1 : index
    %c0_21 = arith.constant 0 : index
    %c0_22 = arith.constant 0 : index
    %44 = vector.load %arg4[%c0_20, %c1, %c0_21, %c0_22] : memref<1x5x8x128xf32, #tpu.memory_space<vmem>>, vector<1x1x8x128xf32>
    %45 = vector.shape_cast %44 : vector<1x1x8x128xf32> to vector<8x128xf32>
    %46 = arith.addf %45, %28 : vector<8x128xf32>
    %c0_23 = arith.constant 0 : index
    %c1_24 = arith.constant 1 : index
    %c0_25 = arith.constant 0 : index
    %c0_26 = arith.constant 0 : index
    %47 = vector.load %arg4[%c0_23, %c1_24, %c0_25, %c0_26] : memref<1x5x8x128xf32, #tpu.memory_space<vmem>>, vector<1x1x8x128xf32>
    %48 = vector.shape_cast %47 : vector<1x1x8x128xf32> to vector<8x128xf32>
    %49 = vector.shape_cast %46 : vector<8x128xf32> to vector<1x1x8x128xf32>
    tpu.vector_store %arg4[%c0_23, %c1_24, %c0_25, %c0_26], %49 {strides = array<i32>} : memref<1x5x8x128xf32, #tpu.memory_space<vmem>>, vector<1x1x8x128xf32>,
    %c0_27 = arith.constant 0 : index
    %c2 = arith.constant 2 : index
    %c0_28 = arith.constant 0 : index
    %c0_29 = arith.constant 0 : index
    %50 = vector.load %arg4[%c0_27, %c2, %c0_28, %c0_29] : memref<1x5x8x128xf32, #tpu.memory_space<vmem>>, vector<1x1x8x128xf32>
    %51 = vector.shape_cast %50 : vector<1x1x8x128xf32> to vector<8x128xf32>
    %52 = arith.addf %51, %31 : vector<8x128xf32>
    %c0_30 = arith.constant 0 : index
    %c2_31 = arith.constant 2 : index
    %c0_32 = arith.constant 0 : index
    %c0_33 = arith.constant 0 : index
    %53 = vector.load %arg4[%c0_30, %c2_31, %c0_32, %c0_33] : memref<1x5x8x128xf32, #tpu.memory_space<vmem>>, vector<1x1x8x128xf32>
    %54 = vector.shape_cast %53 : vector<1x1x8x128xf32> to vector<8x128xf32>
    %55 = vector.shape_cast %52 : vector<8x128xf32> to vector<1x1x8x128xf32>
    tpu.vector_store %arg4[%c0_30, %c2_31, %c0_32, %c0_33], %55 {strides = array<i32>} : memref<1x5x8x128xf32, #tpu.memory_space<vmem>>, vector<1x1x8x128xf32>,
    %c0_34 = arith.constant 0 : index
    %c3 = arith.constant 3 : index
    %c0_35 = arith.constant 0 : index
    %c0_36 = arith.constant 0 : index
    %56 = vector.load %arg4[%c0_34, %c3, %c0_35, %c0_36] : memref<1x5x8x128xf32, #tpu.memory_space<vmem>>, vector<1x1x8x128xf32>
    %57 = vector.shape_cast %56 : vector<1x1x8x128xf32> to vector<8x128xf32>
    %58 = arith.addf %57, %34 : vector<8x128xf32>
    %c0_37 = arith.constant 0 : index
    %c3_38 = arith.constant 3 : index
    %c0_39 = arith.constant 0 : index
    %c0_40 = arith.constant 0 : index
    %59 = vector.load %arg4[%c0_37, %c3_38, %c0_39, %c0_40] : memref<1x5x8x128xf32, #tpu.memory_space<vmem>>, vector<1x1x8x128xf32>
    %60 = vector.shape_cast %59 : vector<1x1x8x128xf32> to vector<8x128xf32>
    %61 = vector.shape_cast %58 : vector<8x128xf32> to vector<1x1x8x128xf32>
    tpu.vector_store %arg4[%c0_37, %c3_38, %c0_39, %c0_40], %61 {strides = array<i32>} : memref<1x5x8x128xf32, #tpu.memory_space<vmem>>, vector<1x1x8x128xf32>,
    %c0_41 = arith.constant 0 : index
    %c4 = arith.constant 4 : index
    %c0_42 = arith.constant 0 : index
    %c0_43 = arith.constant 0 : index
    %62 = vector.load %arg4[%c0_41, %c4, %c0_42, %c0_43] : memref<1x5x8x128xf32, #tpu.memory_space<vmem>>, vector<1x1x8x128xf32>
    %63 = vector.shape_cast %62 : vector<1x1x8x128xf32> to vector<8x128xf32>
    %64 = arith.addf %63, %37 : vector<8x128xf32>
    %c0_44 = arith.constant 0 : index
    %c4_45 = arith.constant 4 : index
    %c0_46 = arith.constant 0 : index
    %c0_47 = arith.constant 0 : index
    %65 = vector.load %arg4[%c0_44, %c4_45, %c0_46, %c0_47] : memref<1x5x8x128xf32, #tpu.memory_space<vmem>>, vector<1x1x8x128xf32>
    %66 = vector.shape_cast %65 : vector<1x1x8x128xf32> to vector<8x128xf32>
    %67 = vector.shape_cast %64 : vector<8x128xf32> to vector<1x1x8x128xf32>
    tpu.vector_store %arg4[%c0_44, %c4_45, %c0_46, %c0_47], %67 {strides = array<i32>} : memref<1x5x8x128xf32, #tpu.memory_space<vmem>>, vector<1x1x8x128xf32>,
    return
  }
  func.func @transform_0(%arg0: i32, %arg1: i32) -> (i32, i32) {
    %c1_i32 = arith.constant 1 : i32
    %0 = arith.muli %arg0, %c1_i32 : i32
    %1 = arith.addi %0, %arg1 : i32
    %c0_i32 = arith.constant 0 : i32
    %c0_i32_0 = arith.constant 0 : i32
    return %1, %c0_i32 : i32, i32
  }
  func.func @transform_1(%arg0: i32, %arg1: i32) -> (i32, i32) {
    %c1_i32 = arith.constant 1 : i32
    %0 = arith.muli %arg0, %c1_i32 : i32
    %1 = arith.addi %0, %arg1 : i32
    %c0_i32 = arith.constant 0 : i32
    %c0_i32_0 = arith.constant 0 : i32
    return %1, %c0_i32 : i32, i32
  }
  func.func @transform_2(%arg0: i32, %arg1: i32) -> (i32, i32, i32, i32) {
    %c0_i32 = arith.constant 0 : i32
    %c0_i32_0 = arith.constant 0 : i32
    %c0_i32_1 = arith.constant 0 : i32
    %c0_i32_2 = arith.constant 0 : i32
    return %arg0, %c0_i32, %c0_i32_0, %c0_i32_1 : i32, i32, i32, i32
  }
}

</mosaic_0001>

<bundles_post_ra>
// kernel: _lambda_.1
= control target key start
LH: loop header
LB: loop body
LE: loop exit
PB: predicated region body
PF: predicated region fallthrough
CT: control target
= control target key end

     0   :  { %s194_s0 = inlined_call_operand.vmem [shape: f32[16,128], index: 0, kind: input, shape index: {}]   ;;  %s195_s1 = inlined_call_operand.vmem [shape: f32[16,128], index: 1, kind: input, shape index: {}]   ;;  %s196_s2 = inlined_call_operand.vmem [shape: f32[1,5,8,128], index: 2, kind: output, shape index: {}]  }
   0x1   :  { %v64_v0 = vld [vmem:[%s194_s0] sm:$0xff]  ;;  %v65_v1 = vld [vmem:[%s194_s0 + $0x8] sm:$0xff] }
   0x2   :  { %v66_v2 = vld [vmem:[%s195_s1] sm:$0xff]  ;;  %v67_v3 = vld [vmem:[%s195_s1 + $0x8] sm:$0xff]  ;;  %v68_v4 = vmax.f32 %v64_v0, 1e-07  ;;  %v69_v5 = vmax.f32 %v65_v1, 1e-07  ;;  %v92_v7 = vadd.f32 %v65_v1, %v64_v0 }
   0x3   :  { %v88_v6 = vmul.f32 %v66_v2, %v64_v0  ;;  %v89_v8 = vmul.f32 %v67_v3, %v65_v1  ;;  %v94_v9 = vadd.f32 %v67_v3, %v66_v2  ;;  %v78_v18 = vsub.f32 1.0, %v66_v2 }
   0x4   :  { %v70_v10 = vmin.f32 %v68_v4, 0.9999999  ;;  %v71_v11 = vmin.f32 %v69_v5, 0.9999999  ;;  %136 = vst [vmem:[%s196_s2 + $0x8] sm:$0xff] %v92_v7  ;;  %v79_v21 = vsub.f32 1.0, %v67_v3 }
   0x5   :  { %v90_v12 = vadd.f32 %v89_v8, %v88_v6  ;;  %138 = vst [vmem:[%s196_s2 + $0x10] sm:$0xff] %v94_v9 }
   0x6   :  { %144 = vlog2.f32 %v70_v10  ;;  %v80_v13 = vsub.f32 1.0, %v70_v10  ;;  %v81_v14 = vsub.f32 1.0, %v71_v11 }
   0x7   :  { %146 = vlog2.f32 %v71_v11  ;;  %102 = vst [vmem:[%s196_s2] sm:$0xff] %v90_v12 }
   0x8   :  { %148 = vlog2.f32 %v80_v13 }
   0x9   :  { %150 = vlog2.f32 %v81_v14 }
  0x10   :  { %v145_v15 = vpop.eup %144 }
  0x11   :  { %v147_v16 = vpop.eup %146  ;;  %v73_v17 = vmul.f32 0.6931472, %v145_v15 }
  0x12   :  { %v149_v19 = vpop.eup %148  ;;  %v75_v20 = vmul.f32 0.6931472, %v147_v16 }
  0x13   :  { %v151_v22 = vpop.eup %150  ;;  %v76_v23 = vmul.f32 %v73_v17, %v66_v2  ;;  %v83_v24 = vmul.f32 0.6931472, %v149_v19 }
  0x14   :  { %v77_v25 = vmul.f32 %v75_v20, %v67_v3  ;;  %v85_v26 = vmul.f32 0.6931472, %v151_v22 }
  0x15   :  { %v86_v27 = vmul.f32 %v83_v24, %v78_v18 }
  0x16   :  { %v96_v28 = vadd.f32 %v77_v25, %v76_v23  ;;  %v87_v29 = vmul.f32 %v85_v26, %v79_v21 }
  0x18   :  { %v98_v30 = vadd.f32 %v87_v29, %v86_v27  ;;  %140 = vst [vmem:[%s196_s2 + $0x18] sm:$0xff] %v96_v28 }
  0x1a   :  { %142 = vst [vmem:[%s196_s2 + $0x20] sm:$0xff] %v98_v30 }

</bundles_post_ra>
